<compile_context>
chip_gen: v7x
topology: tpu7x:2x2x1
jax: 0.10.0
libtpu: 0.0.40
codegen_flags: <defaults>
</compile_context>

<pallas_src>
import functools

import jax
import jax.numpy as jnp
from jax import lax
from jax.experimental import pallas as pl
from jax.experimental.pallas import tpu as pltpu


# ---------------------------------------------------------------------------
# Pallas kernel: one row-tile of the output per grid step.
# ---------------------------------------------------------------------------
def _veckm_kernel(radius_sq, sqrt_d, d,
                  qy_ref,       # (tm, 1)  f32  y coords of query rows
                  qz_ref,       # (tm, 1)  f32  z coords of query rows
                  ky_ref,       # (1, n)   f32  y coords of all points (resident)
                  kz_ref,       # (1, n)   f32  z coords of all points (resident)
                  epa_q_ref,    # (tm, 2d) f32  [cos|sin] of query rows
                  epa_mm_ref,   # (n, 2d)  compute dtype, RHS of hot matmul (resident)
                  out_ref):     # (tm, 2d) f32  [re | im]
    # --- adjacency J (tm, n): ||pts[i,1:] - pts[j,1:]||^2 < radius^2 -------
    # Pure VPU work (broadcast sub/mul/add + compare + convert); overlaps MXU.
    dy = qy_ref[...] - ky_ref[...]            # (tm, n)
    dz = qz_ref[...] - kz_ref[...]            # (tm, n)
    dist2 = dy * dy + dz * dz
    J = (dist2 < radius_sq).astype(epa_mm_ref.dtype)

    # --- the single hot matmul: g = J @ [cos|sin]  -> (tm, 2d) f32 ---------
    g = jnp.dot(J, epa_mm_ref[...], preferred_element_type=jnp.float32)

    g_re = g[:, :d]
    g_im = g[:, d:]
    cq = epa_q_ref[:, :d]
    sq = epa_q_ref[:, d:]

    # --- divide by (cq + i*sq); |cq + i*sq| == 1 so this is a conjugate mul -
    re = g_re * cq + g_im * sq
    im = g_im * cq - g_re * sq

    # --- per-row L2 normalization * sqrt(d), via rsqrt (EUP, free slot) -----
    sumsq = jnp.sum(re * re + im * im, axis=-1, keepdims=True)
    scale = sqrt_d * lax.rsqrt(sumsq)
    out_ref[:, :d] = re * scale
    out_ref[:, d:] = im * scale


# ---------------------------------------------------------------------------
# Wrapper
# ---------------------------------------------------------------------------
def veckm_forward(pts, A, *, radius=1.0, tile_rows=None,
                  compute_dtype=jnp.float32):
    """pts: (n, 3) f32, A: (3, d) f32  ->  (n, d) complex64.

    compute_dtype: dtype of J / epA fed to the MXU (jnp.bfloat16 is the
    v6e/v7x knob; default f32 matches the reference to tight tolerance).
    """
    n, _ = pts.shape
    d = A.shape[1]
    assert d % 128 == 0, "d must be a multiple of 128 for lane-dense tiles"

    if tile_rows is None:
        tile_rows = 256                      # MXU depth on v6e/v7x
    tile_rows = min(tile_rows, n)
    if n % tile_rows != 0:
        cand = [t for t in range(8, tile_rows + 1, 8) if n % t == 0]
        tile_rows = cand[-1] if cand else n
    assert n % tile_rows == 0
    assert tile_rows % 8 == 0 or tile_rows == n

    sqrt_d = float(d) ** 0.5
    radius_sq = float(radius) ** 2

    pts = pts.astype(jnp.float32)
    A = A.astype(jnp.float32)

    # --- hoisted once: projection + trig (O(n*d) transcendentals total) ----
    pA = pts @ A                                                   # (n, d)
    epa = jnp.concatenate([jnp.cos(pA), jnp.sin(pA)], axis=1)      # (n, 2d) f32
    epa_mm = epa if compute_dtype == jnp.float32 else epa.astype(compute_dtype)

    # yz coords, split into columns so the kernel does pure broadcasts.
    qy = pts[:, 1:2]                   # (n, 1)
    qz = pts[:, 2:3]                   # (n, 1)
    ky_t = jnp.transpose(qy)           # (1, n)
    kz_t = jnp.transpose(qz)           # (1, n)

    kernel = functools.partial(_veckm_kernel, radius_sq, sqrt_d, d)

    # --- rough VMEM budget (residents + per-step working set) --------------
    mm_item = jnp.dtype(compute_dtype).itemsize
    resident_bytes = n * 2 * d * mm_item + 2 * n * 4
    per_step_bytes = (tile_rows * 2 * d * 4 * 4            # epA tile, out tile, g
                      + tile_rows * n * (mm_item + 3 * 4)  # J + dist2 temps
                      + tile_rows * 4 * 4)
    vmem_limit = int(min(100 << 20,
                         max(32 << 20, 2 * resident_bytes + 3 * per_step_bytes)))

    grid = (n // tile_rows,)

    def build_in_specs(single_buffer_resident):
        if single_buffer_resident:
            resident = lambda shape: pl.BlockSpec(
                shape, lambda i: (0, 0), pipeline_mode=pl.Buffered(1))
        else:
            resident = lambda shape: pl.BlockSpec(shape, lambda i: (0, 0))
        return [
            pl.BlockSpec((tile_rows, 1), lambda i: (i, 0)),       # qy tile
            pl.BlockSpec((tile_rows, 1), lambda i: (i, 0)),       # qz tile
            resident((1, n)),                                     # ky^T (resident)
            resident((1, n)),                                     # kz^T (resident)
            pl.BlockSpec((tile_rows, 2 * d), lambda i: (i, 0)),   # epA tile (f32)
            resident((n, 2 * d)),                                 # epA full (mm dtype)
        ]

    def run(single_buffer_resident):
        out = pl.pallas_call(
            kernel,
            out_shape=jax.ShapeDtypeStruct((n, 2 * d), jnp.float32),
            grid=grid,
            in_specs=build_in_specs(single_buffer_resident),
            out_specs=pl.BlockSpec((tile_rows, 2 * d), lambda i: (i, 0)),
            compiler_params=pltpu.CompilerParams(
                dimension_semantics=("parallel",),
                vmem_limit_bytes=vmem_limit),
        )(qy, qz, ky_t, kz_t, epa, epa_mm)
        return jax.block_until_ready(out)

    try:
        out = run(True)      # single-buffer the constant-resident operands
    except Exception:
        # Fallback for jax versions where pipeline_mode isn't supported on
        # the pallas_call grid pipeline: default double buffering.
        out = run(False)

    return lax.complex(out[:, :d], out[:, d:])


# ---------------------------------------------------------------------------
# Deterministic parameter init (strict_standard_normal, VecKM.__init__)
# ---------------------------------------------------------------------------
def strict_standard_normal(d, key):
    # inverse-normal-CDF of an even grid, deterministically permuted
    y = jnp.linspace(0.0, 1.0, d + 2)[1:-1]
    x = jax.scipy.special.ndtri(y)
    x = jax.random.permutation(key, x)
    return x.astype(jnp.float32)


def make_A(d, alpha, key):
    keys = jax.random.split(key, 3)
    rows = [strict_standard_normal(d, k) for k in keys]
    return jnp.stack(rows, axis=0) * alpha          # (3, d)


# ---------------------------------------------------------------------------
# Pure-JAX reference (mirrors the PyTorch forward exactly)
# ---------------------------------------------------------------------------
def veckm_reference(pts, A, radius, d):
    diff = pts[:, None, 1:] - pts[None, :, 1:]
    dist = jnp.sqrt(jnp.sum(diff * diff, axis=-1))
    J = jnp.where(dist < radius, 1.0, 0.0).astype(jnp.float32)
    pA = pts @ A
    epA = jnp.concatenate([jnp.cos(pA), jnp.sin(pA)], axis=1)
    G = J @ epA
    Gc = (G[:, :d] + 1j * G[:, d:]) / (jnp.cos(pA) + 1j * jnp.sin(pA))
    Gc = Gc / jnp.linalg.norm(Gc, axis=-1, keepdims=True) * (d ** 0.5)
    return Gc.astype(jnp.complex64)


if __name__ == "__main__":
    # Small shapes consistent with the module: n points, d features.
    n, d = 64, 128
    alpha, radius = 5.0, 1.0

    key = jax.random.PRNGKey(0)
    k_pts, k_A = jax.random.split(key)
    pts = jax.random.normal(k_pts, (n, 3), dtype=jnp.float32) * 0.7
    A = make_A(d, alpha, k_A)

    G = veckm_forward(pts, A, radius=radius)
    G = jax.block_until_ready(G)

    G_ref = jax.block_until_ready(veckm_reference(pts, A, radius, d))

    assert G.shape == (n, d) and G.dtype == jnp.complex64
    assert jnp.allclose(G.real, G_ref.real, rtol=1e-3, atol=1e-3)
    assert jnp.allclose(G.imag, G_ref.imag, rtol=1e-3, atol=1e-3)

    print("KERNEL_OK")
</pallas_src>

<mosaic_0001>
module attributes {stable_mosaic.version = 11 : i64} {
  func.func @_veckm_kernel(%arg0: i32, %arg1: memref<64x1xf32, #tpu.memory_space<vmem>>, %arg2: memref<64x1xf32, #tpu.memory_space<vmem>>, %arg3: memref<1x64xf32, #tpu.memory_space<vmem>>, %arg4: memref<1x64xf32, #tpu.memory_space<vmem>>, %arg5: memref<64x256xf32, #tpu.memory_space<vmem>>, %arg6: memref<64x256xf32, #tpu.memory_space<vmem>>, %arg7: memref<64x256xf32, #tpu.memory_space<vmem>>) attributes {dimension_semantics = [#tpu.dimension_semantics<parallel>], iteration_bounds = array<i64: 1>, scalar_prefetch = 0 : i64, scratch_operands = 0 : i64, tpu.core_type = #tpu.core_type<tc>, window_params = [{transform_indices = @transform_0, window_bounds = array<i64: 64, 1>}, {transform_indices = @transform_1, window_bounds = array<i64: 64, 1>}, {pipeline_mode = #tpu.pipeline_mode<synchronous>, transform_indices = @transform_2, window_bounds = array<i64: 1, 64>}, {pipeline_mode = #tpu.pipeline_mode<synchronous>, transform_indices = @transform_3, window_bounds = array<i64: 1, 64>}, {transform_indices = @transform_4, window_bounds = array<i64: 64, 256>}, {pipeline_mode = #tpu.pipeline_mode<synchronous>, transform_indices = @transform_5, window_bounds = array<i64: 64, 256>}, {transform_indices = @transform_6, window_bounds = array<i64: 64, 256>}]} {
    %c0 = arith.constant 0 : index
    %c0_0 = arith.constant 0 : index
    %0 = vector.load %arg1[%c0, %c0_0] : memref<64x1xf32, #tpu.memory_space<vmem>>, vector<64x1xf32>
    %c0_1 = arith.constant 0 : index
    %c0_2 = arith.constant 0 : index
    %1 = vector.load %arg3[%c0_1, %c0_2] : memref<1x64xf32, #tpu.memory_space<vmem>>, vector<1x64xf32>
    %2 = vector.broadcast %0 : vector<64x1xf32> to vector<64x64xf32>
    %3 = vector.broadcast %1 : vector<1x64xf32> to vector<64x64xf32>
    %4 = arith.subf %2, %3 : vector<64x64xf32>
    %c0_3 = arith.constant 0 : index
    %c0_4 = arith.constant 0 : index
    %5 = vector.load %arg2[%c0_3, %c0_4] : memref<64x1xf32, #tpu.memory_space<vmem>>, vector<64x1xf32>
    %c0_5 = arith.constant 0 : index
    %c0_6 = arith.constant 0 : index
    %6 = vector.load %arg4[%c0_5, %c0_6] : memref<1x64xf32, #tpu.memory_space<vmem>>, vector<1x64xf32>
    %7 = vector.broadcast %5 : vector<64x1xf32> to vector<64x64xf32>
    %8 = vector.broadcast %6 : vector<1x64xf32> to vector<64x64xf32>
    %9 = arith.subf %7, %8 : vector<64x64xf32>
    %10 = arith.mulf %4, %4 : vector<64x64xf32>
    %11 = arith.mulf %9, %9 : vector<64x64xf32>
    %12 = arith.addf %10, %11 : vector<64x64xf32>
    %cst = arith.constant 1.000000e+00 : f32
    %13 = vector.broadcast %cst : f32 to vector<64x64xf32>
    %14 = arith.cmpf olt, %12, %13 : vector<64x64xf32>
    %15 = arith.extui %14 : vector<64x64xi1> to vector<64x64xi32>
    %16 = arith.sitofp %15 : vector<64x64xi32> to vector<64x64xf32>
    %c0_7 = arith.constant 0 : index
    %c0_8 = arith.constant 0 : index
    %17 = vector.load %arg6[%c0_7, %c0_8] : memref<64x256xf32, #tpu.memory_space<vmem>>, vector<64x256xf32>
    %cst_9 = arith.constant dense<0.000000e+00> : vector<64x256xf32>
    %18 = tpu.matmul %16, %17, %cst_9 {dimension_numbers = #tpu.dot_dimension_numbers<[1], [0], [0], [1], [0, 0, 1, 1], [], []>} : vector<64x64xf32>, vector<64x256xf32>, vector<64x256xf32> -> vector<64x256xf32>
    %19 = vector.extract_strided_slice %18 {offsets = [0, 0], sizes = [64, 128], strides = [1, 1]} : vector<64x256xf32> to vector<64x128xf32>
    %20 = vector.extract_strided_slice %18 {offsets = [0, 128], sizes = [64, 128], strides = [1, 1]} : vector<64x256xf32> to vector<64x128xf32>
    %c0_10 = arith.constant 0 : index
    %c0_11 = arith.constant 0 : index
    %21 = vector.load %arg5[%c0_10, %c0_11] : memref<64x256xf32, #tpu.memory_space<vmem>>, vector<64x128xf32>
    %c0_12 = arith.constant 0 : index
    %c128 = arith.constant 128 : index
    %22 = vector.load %arg5[%c0_12, %c128] : memref<64x256xf32, #tpu.memory_space<vmem>>, vector<64x128xf32>
    %23 = arith.mulf %19, %21 : vector<64x128xf32>
    %24 = arith.mulf %20, %22 : vector<64x128xf32>
    %25 = arith.addf %23, %24 : vector<64x128xf32>
    %26 = arith.mulf %20, %21 : vector<64x128xf32>
    %27 = arith.mulf %19, %22 : vector<64x128xf32>
    %28 = arith.subf %26, %27 : vector<64x128xf32>
    %29 = arith.mulf %25, %25 : vector<64x128xf32>
    %30 = arith.mulf %28, %28 : vector<64x128xf32>
    %31 = arith.addf %29, %30 : vector<64x128xf32>
    %cst_13 = arith.constant dense<0.000000e+00> : vector<64xf32>
    %32 = vector.multi_reduction <add>, %31, %cst_13 [1] : vector<64x128xf32> to vector<64xf32>
    %33 = vector.shape_cast %32 : vector<64xf32> to vector<64x1xf32>
    %34 = math.rsqrt %33 : vector<64x1xf32>
    %cst_14 = arith.constant 11.3137083 : f32
    %35 = vector.broadcast %cst_14 : f32 to vector<64x1xf32>
    %36 = arith.mulf %35, %34 : vector<64x1xf32>
    %37 = vector.broadcast %36 : vector<64x1xf32> to vector<64x128xf32>
    %38 = arith.mulf %25, %37 : vector<64x128xf32>
    %c0_15 = arith.constant 0 : index
    %c0_16 = arith.constant 0 : index
    %39 = vector.load %arg7[%c0_15, %c0_16] : memref<64x256xf32, #tpu.memory_space<vmem>>, vector<64x128xf32>
    tpu.vector_store %arg7[%c0_15, %c0_16], %38 {strides = array<i32>} : memref<64x256xf32, #tpu.memory_space<vmem>>, vector<64x128xf32>,
    %40 = vector.broadcast %36 : vector<64x1xf32> to vector<64x128xf32>
    %41 = arith.mulf %28, %40 : vector<64x128xf32>
    %c0_17 = arith.constant 0 : index
    %c128_18 = arith.constant 128 : index
    %42 = vector.load %arg7[%c0_17, %c128_18] : memref<64x256xf32, #tpu.memory_space<vmem>>, vector<64x128xf32>
    tpu.vector_store %arg7[%c0_17, %c128_18], %41 {strides = array<i32>} : memref<64x256xf32, #tpu.memory_space<vmem>>, vector<64x128xf32>,
    return
  }
  func.func @transform_0(%arg0: i32) -> (i32, i32) {
    %c0_i32 = arith.constant 0 : i32
    %c0_i32_0 = arith.constant 0 : i32
    return %arg0, %c0_i32 : i32, i32
  }
  func.func @transform_1(%arg0: i32) -> (i32, i32) {
    %c0_i32 = arith.constant 0 : i32
    %c0_i32_0 = arith.constant 0 : i32
    return %arg0, %c0_i32 : i32, i32
  }
  func.func @transform_2(%arg0: i32) -> (i32, i32) {
    %c0_i32 = arith.constant 0 : i32
    %c0_i32_0 = arith.constant 0 : i32
    %c0_i32_1 = arith.constant 0 : i32
    return %c0_i32, %c0_i32_0 : i32, i32
  }
  func.func @transform_3(%arg0: i32) -> (i32, i32) {
    %c0_i32 = arith.constant 0 : i32
    %c0_i32_0 = arith.constant 0 : i32
    %c0_i32_1 = arith.constant 0 : i32
    return %c0_i32, %c0_i32_0 : i32, i32
  }
  func.func @transform_4(%arg0: i32) -> (i32, i32) {
    %c0_i32 = arith.constant 0 : i32
    %c0_i32_0 = arith.constant 0 : i32
    return %arg0, %c0_i32 : i32, i32
  }
  func.func @transform_5(%arg0: i32) -> (i32, i32) {
    %c0_i32 = arith.constant 0 : i32
    %c0_i32_0 = arith.constant 0 : i32
    %c0_i32_1 = arith.constant 0 : i32
    return %c0_i32, %c0_i32_0 : i32, i32
  }
  func.func @transform_6(%arg0: i32) -> (i32, i32) {
    %c0_i32 = arith.constant 0 : i32
    %c0_i32_0 = arith.constant 0 : i32
    return %arg0, %c0_i32 : i32, i32
  }
}

module attributes {stable_mosaic.version = 11 : i64} {
  func.func @_veckm_kernel(%arg0: i32, %arg1: memref<64x1xf32, #tpu.memory_space<vmem>>, %arg2: memref<64x1xf32, #tpu.memory_space<vmem>>, %arg3: memref<1x64xf32, #tpu.memory_space<vmem>>, %arg4: memref<1x64xf32, #tpu.memory_space<vmem>>, %arg5: memref<64x256xf32, #tpu.memory_space<vmem>>, %arg6: memref<64x256xf32, #tpu.memory_space<vmem>>, %arg7: memref<64x256xf32, #tpu.memory_space<vmem>>) attributes {dimension_semantics = [#tpu.dimension_semantics<parallel>], iteration_bounds = array<i64: 1>, scalar_prefetch = 0 : i64, scratch_operands = 0 : i64, tpu.core_type = #tpu.core_type<tc>, window_params = [{transform_indices = @transform_0, window_bounds = array<i64: 64, 1>}, {transform_indices = @transform_1, window_bounds = array<i64: 64, 1>}, {pipeline_mode = #tpu.pipeline_mode<synchronous>, transform_indices = @transform_2, window_bounds = array<i64: 1, 64>}, {pipeline_mode = #tpu.pipeline_mode<synchronous>, transform_indices = @transform_3, window_bounds = array<i64: 1, 64>}, {transform_indices = @transform_4, window_bounds = array<i64: 64, 256>}, {pipeline_mode = #tpu.pipeline_mode<synchronous>, transform_indices = @transform_5, window_bounds = array<i64: 64, 256>}, {transform_indices = @transform_6, window_bounds = array<i64: 64, 256>}]} {
    %c0 = arith.constant 0 : index
    %c0_0 = arith.constant 0 : index
    %0 = vector.load %arg1[%c0, %c0_0] : memref<64x1xf32, #tpu.memory_space<vmem>>, vector<64x1xf32>
    %c0_1 = arith.constant 0 : index
    %c0_2 = arith.constant 0 : index
    %1 = vector.load %arg3[%c0_1, %c0_2] : memref<1x64xf32, #tpu.memory_space<vmem>>, vector<1x64xf32>
    %2 = vector.broadcast %0 : vector<64x1xf32> to vector<64x64xf32>
    %3 = vector.broadcast %1 : vector<1x64xf32> to vector<64x64xf32>
    %4 = arith.subf %2, %3 : vector<64x64xf32>
    %c0_3 = arith.constant 0 : index
    %c0_4 = arith.constant 0 : index
    %5 = vector.load %arg2[%c0_3, %c0_4] : memref<64x1xf32, #tpu.memory_space<vmem>>, vector<64x1xf32>
    %c0_5 = arith.constant 0 : index
    %c0_6 = arith.constant 0 : index
    %6 = vector.load %arg4[%c0_5, %c0_6] : memref<1x64xf32, #tpu.memory_space<vmem>>, vector<1x64xf32>
    %7 = vector.broadcast %5 : vector<64x1xf32> to vector<64x64xf32>
    %8 = vector.broadcast %6 : vector<1x64xf32> to vector<64x64xf32>
    %9 = arith.subf %7, %8 : vector<64x64xf32>
    %10 = arith.mulf %4, %4 : vector<64x64xf32>
    %11 = arith.mulf %9, %9 : vector<64x64xf32>
    %12 = arith.addf %10, %11 : vector<64x64xf32>
    %cst = arith.constant 1.000000e+00 : f32
    %13 = vector.broadcast %cst : f32 to vector<64x64xf32>
    %14 = arith.cmpf olt, %12, %13 : vector<64x64xf32>
    %15 = arith.extui %14 : vector<64x64xi1> to vector<64x64xi32>
    %16 = arith.sitofp %15 : vector<64x64xi32> to vector<64x64xf32>
    %c0_7 = arith.constant 0 : index
    %c0_8 = arith.constant 0 : index
    %17 = vector.load %arg6[%c0_7, %c0_8] : memref<64x256xf32, #tpu.memory_space<vmem>>, vector<64x256xf32>
    %cst_9 = arith.constant dense<0.000000e+00> : vector<64x256xf32>
    %18 = tpu.matmul %16, %17, %cst_9 {dimension_numbers = #tpu.dot_dimension_numbers<[1], [0], [0], [1], [0, 0, 1, 1], [], []>} : vector<64x64xf32>, vector<64x256xf32>, vector<64x256xf32> -> vector<64x256xf32>
    %19 = vector.extract_strided_slice %18 {offsets = [0, 0], sizes = [64, 128], strides = [1, 1]} : vector<64x256xf32> to vector<64x128xf32>
    %20 = vector.extract_strided_slice %18 {offsets = [0, 128], sizes = [64, 128], strides = [1, 1]} : vector<64x256xf32> to vector<64x128xf32>
    %c0_10 = arith.constant 0 : index
    %c0_11 = arith.constant 0 : index
    %21 = vector.load %arg5[%c0_10, %c0_11] : memref<64x256xf32, #tpu.memory_space<vmem>>, vector<64x128xf32>
    %c0_12 = arith.constant 0 : index
    %c128 = arith.constant 128 : index
    %22 = vector.load %arg5[%c0_12, %c128] : memref<64x256xf32, #tpu.memory_space<vmem>>, vector<64x128xf32>
    %23 = arith.mulf %19, %21 : vector<64x128xf32>
    %24 = arith.mulf %20, %22 : vector<64x128xf32>
    %25 = arith.addf %23, %24 : vector<64x128xf32>
    %26 = arith.mulf %20, %21 : vector<64x128xf32>
    %27 = arith.mulf %19, %22 : vector<64x128xf32>
    %28 = arith.subf %26, %27 : vector<64x128xf32>
    %29 = arith.mulf %25, %25 : vector<64x128xf32>
    %30 = arith.mulf %28, %28 : vector<64x128xf32>
    %31 = arith.addf %29, %30 : vector<64x128xf32>
    %cst_13 = arith.constant dense<0.000000e+00> : vector<64xf32>
    %32 = vector.multi_reduction <add>, %31, %cst_13 [1] : vector<64x128xf32> to vector<64xf32>
    %33 = vector.shape_cast %32 : vector<64xf32> to vector<64x1xf32>
    %34 = math.rsqrt %33 : vector<64x1xf32>
    %cst_14 = arith.constant 11.3137083 : f32
    %35 = vector.broadcast %cst_14 : f32 to vector<64x1xf32>
    %36 = arith.mulf %35, %34 : vector<64x1xf32>
    %37 = vector.broadcast %36 : vector<64x1xf32> to vector<64x128xf32>
    %38 = arith.mulf %25, %37 : vector<64x128xf32>
    %c0_15 = arith.constant 0 : index
    %c0_16 = arith.constant 0 : index
    %39 = vector.load %arg7[%c0_15, %c0_16] : memref<64x256xf32, #tpu.memory_space<vmem>>, vector<64x128xf32>
    tpu.vector_store %arg7[%c0_15, %c0_16], %38 {strides = array<i32>} : memref<64x256xf32, #tpu.memory_space<vmem>>, vector<64x128xf32>,
    %40 = vector.broadcast %36 : vector<64x1xf32> to vector<64x128xf32>
    %41 = arith.mulf %28, %40 : vector<64x128xf32>
    %c0_17 = arith.constant 0 : index
    %c128_18 = arith.constant 128 : index
    %42 = vector.load %arg7[%c0_17, %c128_18] : memref<64x256xf32, #tpu.memory_space<vmem>>, vector<64x128xf32>
    tpu.vector_store %arg7[%c0_17, %c128_18], %41 {strides = array<i32>} : memref<64x256xf32, #tpu.memory_space<vmem>>, vector<64x128xf32>,
    return
  }
  func.func @transform_0(%arg0: i32) -> (i32, i32) {
    %c0_i32 = arith.constant 0 : i32
    %c0_i32_0 = arith.constant 0 : i32
    return %arg0, %c0_i32 : i32, i32
  }
  func.func @transform_1(%arg0: i32) -> (i32, i32) {
    %c0_i32 = arith.constant 0 : i32
    %c0_i32_0 = arith.constant 0 : i32
    return %arg0, %c0_i32 : i32, i32
  }
  func.func @transform_2(%arg0: i32) -> (i32, i32) {
    %c0_i32 = arith.constant 0 : i32
    %c0_i32_0 = arith.constant 0 : i32
    %c0_i32_1 = arith.constant 0 : i32
    return %c0_i32, %c0_i32_0 : i32, i32
  }
  func.func @transform_3(%arg0: i32) -> (i32, i32) {
    %c0_i32 = arith.constant 0 : i32
    %c0_i32_0 = arith.constant 0 : i32
    %c0_i32_1 = arith.constant 0 : i32
    return %c0_i32, %c0_i32_0 : i32, i32
  }
  func.func @transform_4(%arg0: i32) -> (i32, i32) {
    %c0_i32 = arith.constant 0 : i32
    %c0_i32_0 = arith.constant 0 : i32
    return %arg0, %c0_i32 : i32, i32
  }
  func.func @transform_5(%arg0: i32) -> (i32, i32) {
    %c0_i32 = arith.constant 0 : i32
    %c0_i32_0 = arith.constant 0 : i32
    %c0_i32_1 = arith.constant 0 : i32
    return %c0_i32, %c0_i32_0 : i32, i32
  }
  func.func @transform_6(%arg0: i32) -> (i32, i32) {
    %c0_i32 = arith.constant 0 : i32
    %c0_i32_0 = arith.constant 0 : i32
    return %arg0, %c0_i32 : i32, i32
  }
}

</mosaic_0001>

<bundles_post_ra>
// kernel: tpu_custom_call.1
= control target key start
LH: loop header
LB: loop body
LE: loop exit
PB: predicated region body
PF: predicated region fallthrough
CT: control target
= control target key end

     0   :  { %11 = vsyncpa [#allocation3], 0  ;;  %s946_s0 = inlined_call_operand.vmem [shape: f32[64,1], index: 0, kind: input, shape index: {}]   ;;  %s947_s1 = inlined_call_operand.vmem [shape: f32[64,1], index: 1, kind: input, shape index: {}]   ;;  %s948_s2 = inlined_call_operand.vmem [shape: f32[1,64], index: 2, kind: input, shape index: {}]   ;;  %s949_s3 = inlined_call_operand.vmem [shape: f32[1,64], index: 3, kind: input, shape index: {}]   ;;  %s950_s4 = inlined_call_operand.vmem [shape: f32[64,256], index: 4, kind: input, shape index: {}]   ;;  %s951_s5 = inlined_call_operand.hbm [shape: f32[64,256], index: 5, kind: input, shape index: {}]   ;;  %s952_s6 = inlined_call_operand.hbm [shape: f32[64,256], index: 6, kind: output, shape index: {}]  }
   0x1   :  { %12 = vsyncpa [#allocation4], 0  ;;  %s649_s21 = smov [#allocation2]   ;;  %s601_s25 = scalar_lea.hbm %s951_s5, 2048 }
   0x2   :  { %s28_s22 = sshll.u32 %s649_s21, 4  ;;  %p602_p0 = scmp.ne.s32.totalorder %s951_s5, %s601_s25  ;;  %s29_s22 = int_to_ptr.vmem [resolvable:$true] %s28_s22 }
   0x3   :  { %p605_p1 = scmp.lt.u32.totalorder %s601_s25, %s951_s5 }
   0x5   :  { %p607_p2 = pnand %p605_p1, %p602_p0 }
   0x7   :  { %610 = shalt.err (!%p607_p2)
}
   0x8   :  { %s611_s30 = scalar_lea.vmem %s29_s22, 2048  ;;  %p616_p4 = scmp.lt.s32.totalorder %s29_s22, %s29_s22 }
   0x9   :  { %p612_p3 = scmp.ne.s32.totalorder %s29_s22, %s611_s30  ;;  %p617_p5 = scmp.lt.s32.totalorder %s611_s30, %s611_s30 }
   0xb   :  { %p618_p6 = por %p617_p5, %p616_p4 }
   0xd   :  { %p619_p7 = pnand %p618_p6, %p612_p3 }
   0xf   :  { %622 = shalt.err (!%p619_p7)
}
  0x10   :  { %s650_s7 = smov 256   ;;  %s651_s8 = smov 16  }
  0x11   :  { %34 = dma.hbm_to_vmem [thread:$0]  %s951_s5, 2048, %s29_s22, [#allocation3], %s650_s7, %s650_s7, %s651_s8  }
  0x12   :  { %645 = dma.done.wait [#allocation3], 2048  }
  0x13   :  { %646 = vsyncadd [#allocation3], 4294965248  ;;  %v652_v0 = vmov 0   ;;  %v101_v1 = vld [vmem:[%s947_s1] sm:$0xff]  ;;  %v43_v5 = vld [vmem:[%s946_s0 + $0x28] sm:$0xff]  ;;  %v653_v28 = vmov 0.0  }
  0x14   :  { %584 = vset.pattern.permute.xlu1 %v652_v0  ;;  %583 = vset.pattern.permute.xlu0 %v652_v0  ;;  %v38_v2 = vld [vmem:[%s946_s0] sm:$0xff]  ;;  %v39_v6 = vld [vmem:[%s946_s0 + $0x8] sm:$0xff]  ;;  %v215_v8 = vld [vmem:[#allocation2 + $0x18] sm:$0xff]  ;;  %vm228_vm0 = vcmask 523264  }
  0x15   :  { %112 = vperm.xlu1 %584, %v101_v1   ;;  %49 = vperm.xlu0 %583, %v38_v2   ;;  %v105_v3 = vld [vmem:[%s947_s1 + $0x20] sm:$0xff]  ;;  %v213_v7 = vld [vmem:[#allocation2 + $0x8] sm:$0xff]  ;;  %v214_v11 = vld [vmem:[#allocation2 + $0x10] sm:$0xff] }
  0x16   :  { %v42_v4 = vld [vmem:[%s946_s0 + $0x20] sm:$0xff]  ;;  %v553_v9 = vpack.c.bf16 %v215_v8, %v213_v7  ;;  %v217_v12 = vld [vmem:[#allocation2 + $0x28] sm:$0xff]  ;;  %v219_v14 = vld [vmem:[#allocation2 + $0x38] sm:$0xff]  ;;  %317 = vmatprep.mubr.f32.mxu0 %v653_v28  ;;  %341 = vmatprep.mubr.f32.mxu1 %v653_v28 }
  0x17   :  { %v212_v10 = vld [vmem:[#allocation2] sm:$0xff]  ;;  %v218_v16 = vld [vmem:[#allocation2 + $0x30] sm:$0xff]  ;;  %v557_v17 = vpack.c.bf16 %v219_v14, %v217_v12  ;;  %v221_v18 = vld [vmem:[#allocation2 + $0x48] sm:$0xff] }
  0x18   :  { %v555_v13 = vpack.c.bf16 %v214_v11, %v212_v10  ;;  %v216_v15 = vld [vmem:[#allocation2 + $0x20] sm:$0xff]  ;;  %554 = vmatprep.subr.bf16.mxu0 %v553_v9  ;;  %569 = vmatprep.subr.bf16.mxu1 %v553_v9  ;;  %v223_v19 = vld [vmem:[#allocation2 + $0x58] sm:$0xff]  ;;  %v106_v20 = vld [vmem:[%s947_s1 + $0x28] sm:$0xff] }
  0x19   :  { %132 = vperm.xlu1 %584, %v105_v3   ;;  %69 = vperm.xlu0 %583, %v42_v4   ;;  %v102_v21 = vld [vmem:[%s947_s1 + $0x8] sm:$0xff]  ;;  %v559_v22 = vpack.c.bf16 %v218_v16, %v216_v15  ;;  %v561_v23 = vpack.c.bf16 %v223_v19, %v221_v18  ;;  %v220_v24 = vld [vmem:[#allocation2 + $0x40] sm:$0xff]  ;;  %v222_v25 = vld [vmem:[#allocation2 + $0x50] sm:$0xff] }
  0x1a   :  { %556 = vmatpush1.bf16.msra.mxu0 %v555_v13  ;;  %573 = vmatpush1.bf16.msra.mxu1 %v555_v13  ;;  %v225_v26 = vld [vmem:[#allocation2 + $0x68] sm:$0xff]  ;;  %v227_v27 = vld [vmem:[#allocation2 + $0x78] sm:$0xff]  ;;  %v44_v29 = vld [vmem:[%s946_s0 + $0x30] sm:$0xff]  ;;  %v563_v31 = vpack.c.bf16 %v222_v25, %v220_v24 }
  0x1b   :  { %558 = vmatprep.subr.bf16.mxu0 %v557_v17  ;;  %570 = vmatprep.subr.bf16.mxu1 %v557_v17  ;;  %v40_v30 = vld [vmem:[%s946_s0 + $0x10] sm:$0xff]  ;;  %v565_v32 = vpack.c.bf16 %v227_v27, %v225_v26  ;;  %v224_v33 = vld [vmem:[#allocation2 + $0x60] sm:$0xff]  ;;  %v45_v38 = vld [vmem:[%s946_s0 + $0x38] sm:$0xff] }
  0x1c   :  { %v226_v34 = vld [vmem:[#allocation2 + $0x70] sm:$0xff]  ;;  %v41_v39 = vld [vmem:[%s946_s0 + $0x18] sm:$0xff]  ;;  %v758_v42 = vld [vmem:[%s949_s3] ss:$0 sm:$0xff] }
  0x1d   :  { %74 = vperm.xlu1 %584, %v43_v5   ;;  %54 = vperm.xlu0 %583, %v39_v6   ;;  %v107_v35 = vld [vmem:[%s947_s1 + $0x30] sm:$0xff]  ;;  %v567_v37 = vpack.c.bf16 %v226_v34, %v224_v33  ;;  %v108_v40 = vld [vmem:[%s947_s1 + $0x38] sm:$0xff]  ;;  %v763_v43 = vld [vmem:[%s948_s2] ss:$0 sm:$0xff] }
  0x1e   :  { %560 = vmatpush1.bf16.msra.mxu0 %v559_v22  ;;  %574 = vmatpush1.bf16.msra.mxu1 %v559_v22  ;;  %v103_v36 = vld [vmem:[%s947_s1 + $0x10] sm:$0xff]  ;;  %v104_v41 = vld [vmem:[%s947_s1 + $0x18] sm:$0xff] }
  0x1f   :  { %562 = vmatprep.subr.bf16.mxu0 %v561_v23  ;;  %571 = vmatprep.subr.bf16.mxu1 %v561_v23 }
  0x21   :  { %137 = vperm.xlu1 %584, %v106_v20   ;;  %117 = vperm.xlu0 %583, %v102_v21  }
  0x22   :  { %564 = vmatpush1.bf16.msra.mxu0 %v563_v31  ;;  %575 = vmatpush1.bf16.msra.mxu1 %v563_v31 }
  0x23   :  { %566 = vmatprep.subr.bf16.mxu0 %v565_v32  ;;  %572 = vmatprep.subr.bf16.mxu1 %v565_v32 }
  0x25   :  { %79 = vperm.xlu1 %584, %v44_v29   ;;  %59 = vperm.xlu0 %583, %v40_v30  }
  0x26   :  { %568 = vmatpush1.bf16.msra.mxu0 %v567_v37  ;;  %576 = vmatpush1.bf16.msra.mxu1 %v567_v37 }
  0x29   :  { %142 = vperm.xlu1 %584, %v107_v35   ;;  %122 = vperm.xlu0 %583, %v103_v36  }
  0x2d   :  { %84 = vperm.xlu1 %584, %v45_v38   ;;  %64 = vperm.xlu0 %583, %v41_v39  }
  0x31   :  { %147 = vperm.xlu1 %584, %v108_v40   ;;  %127 = vperm.xlu0 %583, %v104_v41  }
  0x94   :  { %v113_v44 = vpop.permute.xlu1 %112  ;;  %v50_v45 = vpop.permute.xlu0 %49 }
  0x95   :  { %v156_v46 = vsub.f32 %v113_v44, %v758_v42  ;;  %v93_v47 = vsub.f32 %v50_v45, %v763_v43  ;;  %v366_v45 = vld [vmem:[%s950_s4] sm:$0xff] }
  0x97   :  { %v172_v48 = vmul.f32 %v156_v46, %v156_v46  ;;  %v164_v49 = vmul.f32 %v93_v47, %v93_v47  ;;  %v374_v46 = vld [vmem:[%s950_s4 + $0x8] sm:$0xff] }
  0x98   :  { %v133_v50 = vpop.permute.xlu1 %132  ;;  %v70_v51 = vpop.permute.xlu0 %69 }
  0x99   :  { %v180_v52 = vadd.f32 %v172_v48, %v164_v49  ;;  %v160_v53 = vsub.f32 %v133_v50, %v758_v42  ;;  %v97_v54 = vsub.f32 %v70_v51, %v763_v43 }
  0x9b   :  { %vm188_vm1 = vcmp.lt.f32.partialorder %v180_v52, 1.0  ;;  %v176_v55 = vmul.f32 %v160_v53, %v160_v53  ;;  %v168_v56 = vmul.f32 %v97_v54, %v97_v54  ;;  %v378_v53 = vld [vmem:[%s950_s4 + $0x48] sm:$0xff] }
  0x9c   :  { %v75_v57 = vpop.permute.xlu1 %74  ;;  %v55_v58 = vpop.permute.xlu0 %54  ;;  %v537_v59 = vsel %vm188_vm1, 1.0, %v653_v28 }
  0x9d   :  { %v184_v60 = vadd.f32 %v176_v55, %v168_v56  ;;  %545 = vmatmul.mubr.msk.f32.vlgmr.msra.gmra.mrb[0].mxu0 %vm228_vm0, %v537_v59  ;;  %v98_v61 = vsub.f32 %v75_v57, %v763_v43  ;;  %v94_v62 = vsub.f32 %v55_v58, %v763_v43 }
  0x9e   :  { %323 = vmatprep.mubr.f32.mxu0 %v653_v28 }
  0x9f   :  { %vm192_vm2 = vcmp.lt.f32.partialorder %v184_v60, 1.0  ;;  %v169_v4 = vmul.f32 %v98_v61, %v98_v61  ;;  %v165_v5 = vmul.f32 %v94_v62, %v94_v62 }
  0xa0   :  { %v138_v63 = vpop.permute.xlu1 %137  ;;  %v118_v0 = vpop.permute.xlu0 %117  ;;  %v541_v1 = vsel %vm192_vm2, 1.0, %v653_v28 }
  0xa1   :  { %v161_v2 = vsub.f32 %v138_v63, %v758_v42  ;;  %v157_v3 = vsub.f32 %v118_v0, %v758_v42  ;;  %549 = vmatmul.mubr.msk.f32.vlgmr.msra.gmra.mrb[0].mxu1 %vm228_vm0, %v541_v1 }
  0xa2   :  { %347 = vmatprep.mubr.f32.mxu1 %v653_v28 }
  0xa3   :  { %v177_v6 = vmul.f32 %v161_v2, %v161_v2  ;;  %v173_v7 = vmul.f32 %v157_v3, %v157_v3  ;;  %v367_v3 = vld [vmem:[%s950_s4 + $0x10] sm:$0xff] }
  0xa4   :  { %v80_v8 = vpop.permute.xlu1 %79  ;;  %v60_v9 = vpop.permute.xlu0 %59 }
  0xa5   :  { %v185_v10 = vadd.f32 %v177_v6, %v169_v4  ;;  %v181_v11 = vadd.f32 %v173_v7, %v165_v5  ;;  %v99_v12 = vsub.f32 %v80_v8, %v763_v43  ;;  %v95_v13 = vsub.f32 %v60_v9, %v763_v43  ;;  %v375_v4 = vld [vmem:[%s950_s4 + $0x18] sm:$0xff]  ;;  %v371_v5 = vld [vmem:[%s950_s4 + $0x50] sm:$0xff] }
  0xa6   :  { %v379_v6 = vld [vmem:[%s950_s4 + $0x58] sm:$0xff] }
  0xa7   :  { %vm193_vm3 = vcmp.lt.f32.partialorder %v185_v10, 1.0  ;;  %vm189_vm4 = vcmp.lt.f32.partialorder %v181_v11, 1.0  ;;  %v170_v20 = vmul.f32 %v99_v12, %v99_v12  ;;  %v166_v21 = vmul.f32 %v95_v13, %v95_v13 }
  0xa8   :  { %v143_v14 = vpop.permute.xlu1 %142  ;;  %v123_v15 = vpop.permute.xlu0 %122  ;;  %v538_v16 = vsel %vm189_vm4, 1.0, %v653_v28  ;;  %v542_v17 = vsel %vm193_vm3, 1.0, %v653_v28 }
  0xa9   :  { %v162_v18 = vsub.f32 %v143_v14, %v758_v42  ;;  %v158_v19 = vsub.f32 %v123_v15, %v758_v42  ;;  %546 = vmatmul.mubr.msk.f32.gmra.mrb[2].mxu0 %vm228_vm0, %v538_v16  ;;  %550 = vmatmul.mubr.msk.f32.gmra.mrb[2].mxu1 %vm228_vm0, %v542_v17 }
  0xaa   :  { %329 = vmatprep.mubr.f32.mxu0 %v653_v28  ;;  %353 = vmatprep.mubr.f32.mxu1 %v653_v28 }
  0xab   :  { %v178_v22 = vmul.f32 %v162_v18, %v162_v18  ;;  %v174_v23 = vmul.f32 %v158_v19, %v158_v19 }
  0xac   :  { %v85_v24 = vpop.permute.xlu1 %84  ;;  %v65_v25 = vpop.permute.xlu0 %64 }
  0xad   :  { %v186_v26 = vadd.f32 %v178_v22, %v170_v20  ;;  %v182_v27 = vadd.f32 %v174_v23, %v166_v21  ;;  %v100_v29 = vsub.f32 %v85_v24, %v763_v43  ;;  %v96_v30 = vsub.f32 %v65_v25, %v763_v43 }
  0xaf   :  { %vm194_vm5 = vcmp.lt.f32.partialorder %v186_v26, 1.0  ;;  %vm190_vm6 = vcmp.lt.f32.partialorder %v182_v27, 1.0  ;;  %v171_v37 = vmul.f32 %v100_v29, %v100_v29  ;;  %v167_v38 = vmul.f32 %v96_v30, %v96_v30  ;;  %v368_v26 = vld [vmem:[%s950_s4 + $0x20] sm:$0xff]  ;;  %v376_v27 = vld [vmem:[%s950_s4 + $0x28] sm:$0xff] }
  0xb0   :  { %v148_v31 = vpop.permute.xlu1 %147  ;;  %v128_v32 = vpop.permute.xlu0 %127  ;;  %v539_v33 = vsel %vm190_vm6, 1.0, %v653_v28  ;;  %v543_v34 = vsel %vm194_vm5, 1.0, %v653_v28  ;;  %v372_v29 = vld [vmem:[%s950_s4 + $0x60] sm:$0xff]  ;;  %v380_v30 = vld [vmem:[%s950_s4 + $0x68] sm:$0xff] }
  0xb1   :  { %v163_v35 = vsub.f32 %v148_v31, %v758_v42  ;;  %v159_v36 = vsub.f32 %v128_v32, %v758_v42  ;;  %547 = vmatmul.mubr.msk.f32.gmra.mrb[4].mxu0 %vm228_vm0, %v539_v33  ;;  %551 = vmatmul.mubr.msk.f32.gmra.mrb[4].mxu1 %vm228_vm0, %v543_v34 }
  0xb2   :  { %335 = vmatprep.mubr.f32.mxu0 %v653_v28  ;;  %359 = vmatprep.mubr.f32.mxu1 %v653_v28 }
  0xb3   :  { %v179_v39 = vmul.f32 %v163_v35, %v163_v35  ;;  %v175_v40 = vmul.f32 %v159_v36, %v159_v36 }
  0xb5   :  { %v187_v41 = vadd.f32 %v179_v39, %v171_v37  ;;  %v183_v43 = vadd.f32 %v175_v40, %v167_v38 }
  0xb7   :  { %vm195_vm7 = vcmp.lt.f32.partialorder %v187_v41, 1.0  ;;  %vm191_vm8 = vcmp.lt.f32.partialorder %v183_v43, 1.0 }
  0xb8   :  { %v540_v44 = vsel %vm191_vm8, 1.0, %v653_v28  ;;  %v544_v42 = vsel %vm195_vm7, 1.0, %v653_v28  ;;  %v370_v28 = vld [vmem:[%s950_s4 + $0x40] sm:$0xff] }
  0xb9   :  { %548 = vmatmul.mubr.msk.f32.gmra.mrb[6].mxu0 %vm228_vm0, %v540_v44  ;;  %552 = vmatmul.mubr.msk.f32.gmra.mrb[6].mxu1 %vm228_vm0, %v544_v42 }
 0x170   :  { %v319_v47 = vpop.f32.mrb[0].mxu0 }
 0x171   :  { %v382_v48 = vmul.f32 %v366_v45, %v319_v47  ;;  %v414_v49 = vmul.f32 %v374_v46, %v319_v47  ;;  %v321_v50 = vpop.f32.mrb[1].mxu0 }
 0x172   :  { %v390_v51 = vmul.f32 %v374_v46, %v321_v50  ;;  %v406_v52 = vmul.f32 %v366_v45, %v321_v50 }
 0x174   :  { %v815_v54 = vadd.f32 %v390_v51, %v382_v48  ;;  %v817_v55 = vsub.f32 %v406_v52, %v414_v49  ;;  %v343_v56 = vpop.f32.mrb[0].mxu1 }
 0x175   :  { %v386_v57 = vmul.f32 %v370_v28, %v343_v56  ;;  %v418_v58 = vmul.f32 %v378_v53, %v343_v56  ;;  %v345_v59 = vpop.f32.mrb[1].mxu1  ;;  %v373_v56 = vld [vmem:[%s950_s4 + $0x70] sm:$0xff] }
 0x176   :  { %v394_v60 = vmul.f32 %v378_v53, %v345_v59  ;;  %v410_v61 = vmul.f32 %v370_v28, %v345_v59  ;;  %v430_v62 = vmul.f32 %v815_v54, %v815_v54  ;;  %v438_v63 = vmul.f32 %v817_v55, %v817_v55  ;;  %v369_v28 = vld [vmem:[%s950_s4 + $0x30] sm:$0xff]  ;;  %v377_v53 = vld [vmem:[%s950_s4 + $0x38] sm:$0xff] }
 0x178   :  { %v823_v0 = vadd.f32 %v394_v60, %v386_v57  ;;  %v825_v1 = vsub.f32 %v410_v61, %v418_v58  ;;  %v446_v2 = vadd.f32 %v438_v63, %v430_v62  ;;  %v381_v57 = vld [vmem:[%s950_s4 + $0x78] sm:$0xff]  ;;  %s654_s4 = smov [#allocation5]  }
 0x179   :  { %s523_s24 = sshll.u32 %s654_s4, 4  ;;  %s524_s24 = int_to_ptr.vmem [resolvable:$true] %s523_s24 }
 0x17a   :  { %454 = vadd.xlane.f32.xlu0 %v446_v2  ;;  %v434_v7 = vmul.f32 %v823_v0, %v823_v0  ;;  %v442_v8 = vmul.f32 %v825_v1, %v825_v1  ;;  %s623_s25 = scalar_lea.vmem %s524_s24, 2048  ;;  %p628_p9 = scmp.lt.s32.totalorder %s524_s24, %s524_s24 }
 0x17b   :  { %p624_p8 = scmp.ne.s32.totalorder %s524_s24, %s623_s25  ;;  %p629_p10 = scmp.lt.s32.totalorder %s623_s25, %s623_s25 }
 0x17c   :  { %v325_v9 = vpop.f32.mrb[2].mxu0  ;;  %v349_v10 = vpop.f32.mrb[2].mxu1  ;;  %v450_v11 = vadd.f32 %v442_v8, %v434_v7 }
 0x17d   :  { %v383_v12 = vmul.f32 %v367_v3, %v325_v9  ;;  %v415_v13 = vmul.f32 %v375_v4, %v325_v9  ;;  %v387_v14 = vmul.f32 %v371_v5, %v349_v10  ;;  %v419_v15 = vmul.f32 %v379_v6, %v349_v10  ;;  %v327_v16 = vpop.f32.mrb[3].mxu0  ;;  %v351_v17 = vpop.f32.mrb[3].mxu1  ;;  %p630_p11 = por %p629_p10, %p628_p9 }
 0x17e   :  { %v391_v18 = vmul.f32 %v375_v4, %v327_v16  ;;  %v407_v19 = vmul.f32 %v367_v3, %v327_v16  ;;  %v395_v20 = vmul.f32 %v379_v6, %v351_v17  ;;  %v411_v21 = vmul.f32 %v371_v5, %v351_v17  ;;  %462 = vadd.xlane.f32.xlu1 %v450_v11 }
 0x17f   :  { %p631_p12 = pnand %p630_p11, %p624_p8 }
 0x180   :  { %v843_v22 = vadd.f32 %v391_v18, %v383_v12  ;;  %v845_v23 = vsub.f32 %v407_v19, %v415_v13  ;;  %v847_v24 = vadd.f32 %v395_v20, %v387_v14  ;;  %v849_v25 = vsub.f32 %v411_v21, %v419_v15 }
 0x182   :  { %v435_v31 = vmul.f32 %v847_v24, %v847_v24  ;;  %v443_v32 = vmul.f32 %v849_v25, %v849_v25  ;;  %v431_v33 = vmul.f32 %v843_v22, %v843_v22  ;;  %v439_v34 = vmul.f32 %v845_v23, %v845_v23 }
 0x184   :  { %v331_v35 = vpop.f32.mrb[4].mxu0  ;;  %v355_v36 = vpop.f32.mrb[4].mxu1  ;;  %v451_v37 = vadd.f32 %v443_v32, %v435_v31  ;;  %v447_v38 = vadd.f32 %v439_v34, %v431_v33 }
 0x185   :  { %v384_v39 = vmul.f32 %v368_v26, %v331_v35  ;;  %v416_v40 = vmul.f32 %v376_v27, %v331_v35  ;;  %v388_v41 = vmul.f32 %v372_v29, %v355_v36  ;;  %v420_v43 = vmul.f32 %v380_v30, %v355_v36  ;;  %v333_v44 = vpop.f32.mrb[5].mxu0  ;;  %v357_v42 = vpop.f32.mrb[5].mxu1 }
 0x186   :  { %v392_v45 = vmul.f32 %v376_v27, %v333_v44  ;;  %v408_v46 = vmul.f32 %v368_v26, %v333_v44  ;;  %v396_v47 = vmul.f32 %v380_v30, %v357_v42  ;;  %v412_v48 = vmul.f32 %v372_v29, %v357_v42  ;;  %464 = vadd.xlane.f32.xlu0 %v451_v37 }
 0x187   :  { %456 = vadd.xlane.f32.xlu1 %v447_v38 }
 0x188   :  { %v871_v49 = vadd.f32 %v392_v45, %v384_v39  ;;  %v873_v50 = vsub.f32 %v408_v46, %v416_v40  ;;  %v875_v51 = vadd.f32 %v396_v47, %v388_v41  ;;  %v877_v52 = vsub.f32 %v412_v48, %v420_v43 }
 0x18a   :  { %v436_v58 = vmul.f32 %v875_v51, %v875_v51  ;;  %v444_v59 = vmul.f32 %v877_v52, %v877_v52  ;;  %v432_v60 = vmul.f32 %v871_v49, %v871_v49  ;;  %v440_v61 = vmul.f32 %v873_v50, %v873_v50 }
 0x18c   :  { %v337_v62 = vpop.f32.mrb[6].mxu0  ;;  %v361_v63 = vpop.f32.mrb[6].mxu1  ;;  %v452_v2 = vadd.f32 %v444_v59, %v436_v58  ;;  %v448_v3 = vadd.f32 %v440_v61, %v432_v60 }
 0x18d   :  { %v339_v4 = vpop.f32.mrb[7].mxu0  ;;  %v385_v5 = vmul.f32 %v369_v28, %v337_v62  ;;  %v417_v6 = vmul.f32 %v377_v53, %v337_v62  ;;  %v363_v7 = vpop.f32.mrb[7].mxu1  ;;  %v389_v8 = vmul.f32 %v373_v56, %v361_v63  ;;  %v421_v9 = vmul.f32 %v381_v57, %v361_v63 }
 0x18e   :  { %v393_v10 = vmul.f32 %v377_v53, %v339_v4  ;;  %v409_v11 = vmul.f32 %v369_v28, %v339_v4  ;;  %v397_v12 = vmul.f32 %v381_v57, %v363_v7  ;;  %v413_v13 = vmul.f32 %v373_v56, %v363_v7  ;;  %466 = vadd.xlane.f32.xlu1 %v452_v2 }
 0x18f   :  { %458 = vadd.xlane.f32.xlu0 %v448_v3 }
 0x190   :  { %v899_v14 = vadd.f32 %v393_v10, %v385_v5  ;;  %v901_v15 = vsub.f32 %v409_v11, %v417_v6  ;;  %v903_v16 = vadd.f32 %v397_v12, %v389_v8  ;;  %v905_v17 = vsub.f32 %v413_v13, %v421_v9 }
 0x192   :  { %v433_v18 = vmul.f32 %v899_v14, %v899_v14  ;;  %v441_v19 = vmul.f32 %v901_v15, %v901_v15  ;;  %v437_v21 = vmul.f32 %v903_v16, %v903_v16  ;;  %v445_v26 = vmul.f32 %v905_v17, %v905_v17 }
 0x194   :  { %v449_v20 = vadd.f32 %v441_v19, %v433_v18  ;;  %v453_v27 = vadd.f32 %v445_v26, %v437_v21 }
 0x196   :  { %460 = vadd.xlane.f32.xlu0 %v449_v20 }
 0x19a   :  { %468 = vadd.xlane.f32.xlu0 %v453_v27 }
 0x207   :  { %v455_v29 = vpop.xlane.xlu0 %454 }
 0x208   :  { %585 = vrsqrt.f32 %v455_v29 }
 0x20b   :  { %v463_v30 = vpop.xlane.xlu1 %462 }
 0x20c   :  { %587 = vrsqrt.f32 %v463_v30 }
 0x212   :  { %v586_v31 = vpop.eup %585 }
 0x213   :  { %v478_v32 = vmul.f32 11.313708, %v586_v31  ;;  %v465_v33 = vpop.xlane.xlu0 %464 }
 0x214   :  { %v457_v34 = vpop.xlane.xlu1 %456  ;;  %589 = vrsqrt.f32 %v465_v33 }
 0x215   :  { %v486_v35 = vmul.f32 %v478_v32, %v815_v54  ;;  %v502_v36 = vmul.f32 %v478_v32, %v817_v55  ;;  %591 = vrsqrt.f32 %v457_v34 }
 0x216   :  { %v588_v37 = vpop.eup %587 }
 0x217   :  { %494 = vst [vmem:[#allocation5] sm:$0xff] %v486_v35  ;;  %510 = vst [vmem:[#allocation5 + $0x8] sm:$0xff] %v502_v36  ;;  %v482_v38 = vmul.f32 11.313708, %v588_v37 }
 0x219   :  { %v490_v39 = vmul.f32 %v482_v38, %v823_v0  ;;  %v506_v40 = vmul.f32 %v482_v38, %v825_v1 }
 0x21b   :  { %498 = vst [vmem:[#allocation5 + $0x40] sm:$0xff] %v490_v39  ;;  %514 = vst [vmem:[#allocation5 + $0x48] sm:$0xff] %v506_v40  ;;  %v467_v41 = vpop.xlane.xlu1 %466 }
 0x21c   :  { %593 = vrsqrt.f32 %v467_v41  ;;  %v459_v43 = vpop.xlane.xlu0 %458 }
 0x21d   :  { %595 = vrsqrt.f32 %v459_v43 }
 0x21e   :  { %v590_v44 = vpop.eup %589 }
 0x21f   :  { %v592_v42 = vpop.eup %591  ;;  %v483_v54 = vmul.f32 11.313708, %v590_v44 }
 0x220   :  { %v479_v45 = vmul.f32 11.313708, %v592_v42 }
 0x221   :  { %v491_v55 = vmul.f32 %v483_v54, %v847_v24  ;;  %v507_v46 = vmul.f32 %v483_v54, %v849_v25 }
 0x222   :  { %v487_v47 = vmul.f32 %v479_v45, %v843_v22  ;;  %v503_v0 = vmul.f32 %v479_v45, %v845_v23 }
 0x223   :  { %499 = vst [vmem:[#allocation5 + $0x50] sm:$0xff] %v491_v55  ;;  %515 = vst [vmem:[#allocation5 + $0x58] sm:$0xff] %v507_v46  ;;  %v461_v1 = vpop.xlane.xlu0 %460 }
 0x224   :  { %495 = vst [vmem:[#allocation5 + $0x10] sm:$0xff] %v487_v47  ;;  %511 = vst [vmem:[#allocation5 + $0x18] sm:$0xff] %v503_v0  ;;  %597 = vrsqrt.f32 %v461_v1 }
 0x226   :  { %v594_v48 = vpop.eup %593 }
 0x227   :  { %v596_v28 = vpop.eup %595  ;;  %v484_v53 = vmul.f32 11.313708, %v594_v48  ;;  %v469_v56 = vpop.xlane.xlu0 %468 }
 0x228   :  { %v480_v57 = vmul.f32 11.313708, %v596_v28  ;;  %599 = vrsqrt.f32 %v469_v56 }
 0x229   :  { %v492_v24 = vmul.f32 %v484_v53, %v875_v51  ;;  %v508_v25 = vmul.f32 %v484_v53, %v877_v52 }
 0x22a   :  { %v488_v22 = vmul.f32 %v480_v57, %v871_v49  ;;  %v504_v23 = vmul.f32 %v480_v57, %v873_v50 }
 0x22b   :  { %500 = vst [vmem:[#allocation5 + $0x60] sm:$0xff] %v492_v24  ;;  %516 = vst [vmem:[#allocation5 + $0x68] sm:$0xff] %v508_v25 }
 0x22c   :  { %496 = vst [vmem:[#allocation5 + $0x20] sm:$0xff] %v488_v22  ;;  %512 = vst [vmem:[#allocation5 + $0x28] sm:$0xff] %v504_v23 }
 0x22e   :  { %v598_v58 = vpop.eup %597 }
 0x22f   :  { %v481_v59 = vmul.f32 11.313708, %v598_v58 }
 0x231   :  { %v489_v60 = vmul.f32 %v481_v59, %v899_v14  ;;  %v505_v61 = vmul.f32 %v481_v59, %v901_v15 }
 0x232   :  { %v600_v62 = vpop.eup %599 }
 0x233   :  { %497 = vst [vmem:[#allocation5 + $0x30] sm:$0xff] %v489_v60  ;;  %513 = vst [vmem:[#allocation5 + $0x38] sm:$0xff] %v505_v61  ;;  %v485_v51 = vmul.f32 11.313708, %v600_v62 }
 0x235   :  { %v493_v49 = vmul.f32 %v485_v51, %v903_v16  ;;  %v509_v50 = vmul.f32 %v485_v51, %v905_v17 }
 0x237   :  { %501 = vst [vmem:[#allocation5 + $0x70] sm:$0xff] %v493_v49  ;;  %517 = vst [vmem:[#allocation5 + $0x78] sm:$0xff] %v509_v50 }
 0x238   :  { %634 = shalt.err (!%p631_p12)
}
 0x239   :  { %s635_s28 = scalar_lea.hbm %s952_s6, 2048 }
 0x23a   :  { %p636_p13 = scmp.ne.s32.totalorder %s952_s6, %s635_s28  ;;  %p639_p0 = scmp.lt.u32.totalorder %s635_s28, %s952_s6 }
 0x23c   :  { %p641_p1 = pnand %p639_p0, %p636_p13 }
 0x23e   :  { %644 = shalt.err (!%p641_p1)
}
 0x23f   :  { %529 = dma.vmem_to_hbm [thread:$0]  %s524_s24, 2048, %s952_s6, [#allocation4], %s650_s7, %s650_s7, %s651_s8  }
 0x240   :  { %647 = dma.done.wait [#allocation4], 2048  }
 0x241   :  { %648 = vsyncadd [#allocation4], 4294965248 }
 0x242   :  { %533 = vsyncpa [#allocation3], 1 }
 0x243   :  { %534 = vsyncpa [#allocation4], 1 }

// kernel: tpu_custom_call.1
= control target key start
LH: loop header
LB: loop body
LE: loop exit
PB: predicated region body
PF: predicated region fallthrough
CT: control target
= control target key end

     0   :  { %11 = vsyncpa [#allocation3], 0  ;;  %s946_s0 = inlined_call_operand.vmem [shape: f32[64,1], index: 0, kind: input, shape index: {}]   ;;  %s947_s1 = inlined_call_operand.vmem [shape: f32[64,1], index: 1, kind: input, shape index: {}]   ;;  %s948_s2 = inlined_call_operand.vmem [shape: f32[1,64], index: 2, kind: input, shape index: {}]   ;;  %s949_s3 = inlined_call_operand.vmem [shape: f32[1,64], index: 3, kind: input, shape index: {}]   ;;  %s950_s4 = inlined_call_operand.vmem [shape: f32[64,256], index: 4, kind: input, shape index: {}]   ;;  %s951_s5 = inlined_call_operand.hbm [shape: f32[64,256], index: 5, kind: input, shape index: {}]   ;;  %s952_s6 = inlined_call_operand.hbm [shape: f32[64,256], index: 6, kind: output, shape index: {}]  }
   0x1   :  { %12 = vsyncpa [#allocation4], 0  ;;  %s649_s21 = smov [#allocation2]   ;;  %s601_s25 = scalar_lea.hbm %s951_s5, 2048 }
   0x2   :  { %s28_s22 = sshll.u32 %s649_s21, 4  ;;  %p602_p0 = scmp.ne.s32.totalorder %s951_s5, %s601_s25  ;;  %s29_s22 = int_to_ptr.vmem [resolvable:$true] %s28_s22 }
   0x3   :  { %p605_p1 = scmp.lt.u32.totalorder %s601_s25, %s951_s5 }
   0x5   :  { %p607_p2 = pnand %p605_p1, %p602_p0 }
   0x7   :  { %610 = shalt.err (!%p607_p2)
}
   0x8   :  { %s611_s30 = scalar_lea.vmem %s29_s22, 2048  ;;  %p616_p4 = scmp.lt.s32.totalorder %s29_s22, %s29_s22 }
   0x9   :  { %p612_p3 = scmp.ne.s32.totalorder %s29_s22, %s611_s30  ;;  %p617_p5 = scmp.lt.s32.totalorder %s611_s30, %s611_s30 }
   0xb   :  { %p618_p6 = por %p617_p5, %p616_p4 }
   0xd   :  { %p619_p7 = pnand %p618_p6, %p612_p3 }
   0xf   :  { %622 = shalt.err (!%p619_p7)
}
  0x10   :  { %s650_s7 = smov 256   ;;  %s651_s8 = smov 16  }
  0x11   :  { %34 = dma.hbm_to_vmem [thread:$0]  %s951_s5, 2048, %s29_s22, [#allocation3], %s650_s7, %s650_s7, %s651_s8  }
  0x12   :  { %645 = dma.done.wait [#allocation3], 2048  }
  0x13   :  { %646 = vsyncadd [#allocation3], 4294965248  ;;  %v652_v0 = vmov 0   ;;  %v101_v1 = vld [vmem:[%s947_s1] sm:$0xff]  ;;  %v43_v5 = vld [vmem:[%s946_s0 + $0x28] sm:$0xff]  ;;  %v653_v28 = vmov 0.0  }
  0x14   :  { %584 = vset.pattern.permute.xlu1 %v652_v0  ;;  %583 = vset.pattern.permute.xlu0 %v652_v0  ;;  %v38_v2 = vld [vmem:[%s946_s0] sm:$0xff]  ;;  %v39_v6 = vld [vmem:[%s946_s0 + $0x8] sm:$0xff]  ;;  %v215_v8 = vld [vmem:[#allocation2 + $0x18] sm:$0xff]  ;;  %vm228_vm0 = vcmask 523264  }
  0x15   :  { %112 = vperm.xlu1 %584, %v101_v1   ;;  %49 = vperm.xlu0 %583, %v38_v2   ;;  %v105_v3 = vld [vmem:[%s947_s1 + $0x20] sm:$0xff]  ;;  %v213_v7 = vld [vmem:[#allocation2 + $0x8] sm:$0xff]  ;;  %v214_v11 = vld [vmem:[#allocation2 + $0x10] sm:$0xff] }
  0x16   :  { %v42_v4 = vld [vmem:[%s946_s0 + $0x20] sm:$0xff]  ;;  %v553_v9 = vpack.c.bf16 %v215_v8, %v213_v7  ;;  %v217_v12 = vld [vmem:[#allocation2 + $0x28] sm:$0xff]  ;;  %v219_v14 = vld [vmem:[#allocation2 + $0x38] sm:$0xff]  ;;  %317 = vmatprep.mubr.f32.mxu0 %v653_v28  ;;  %341 = vmatprep.mubr.f32.mxu1 %v653_v28 }
  0x17   :  { %v212_v10 = vld [vmem:[#allocation2] sm:$0xff]  ;;  %v218_v16 = vld [vmem:[#allocation2 + $0x30] sm:$0xff]  ;;  %v557_v17 = vpack.c.bf16 %v219_v14, %v217_v12  ;;  %v221_v18 = vld [vmem:[#allocation2 + $0x48] sm:$0xff] }
  0x18   :  { %v555_v13 = vpack.c.bf16 %v214_v11, %v212_v10  ;;  %v216_v15 = vld [vmem:[#allocation2 + $0x20] sm:$0xff]  ;;  %554 = vmatprep.subr.bf16.mxu0 %v553_v9  ;;  %569 = vmatprep.subr.bf16.mxu1 %v553_v9  ;;  %v223_v19 = vld [vmem:[#allocation2 + $0x58] sm:$0xff]  ;;  %v106_v20 = vld [vmem:[%s947_s1 + $0x28] sm:$0xff] }
  0x19   :  { %132 = vperm.xlu1 %584, %v105_v3   ;;  %69 = vperm.xlu0 %583, %v42_v4   ;;  %v102_v21 = vld [vmem:[%s947_s1 + $0x8] sm:$0xff]  ;;  %v559_v22 = vpack.c.bf16 %v218_v16, %v216_v15  ;;  %v561_v23 = vpack.c.bf16 %v223_v19, %v221_v18  ;;  %v220_v24 = vld [vmem:[#allocation2 + $0x40] sm:$0xff]  ;;  %v222_v25 = vld [vmem:[#allocation2 + $0x50] sm:$0xff] }
  0x1a   :  { %556 = vmatpush1.bf16.msra.mxu0 %v555_v13  ;;  %573 = vmatpush1.bf16.msra.mxu1 %v555_v13  ;;  %v225_v26 = vld [vmem:[#allocation2 + $0x68] sm:$0xff]  ;;  %v227_v27 = vld [vmem:[#allocation2 + $0x78] sm:$0xff]  ;;  %v44_v29 = vld [vmem:[%s946_s0 + $0x30] sm:$0xff]  ;;  %v563_v31 = vpack.c.bf16 %v222_v25, %v220_v24 }
  0x1b   :  { %558 = vmatprep.subr.bf16.mxu0 %v557_v17  ;;  %570 = vmatprep.subr.bf16.mxu1 %v557_v17  ;;  %v40_v30 = vld [vmem:[%s946_s0 + $0x10] sm:$0xff]  ;;  %v565_v32 = vpack.c.bf16 %v227_v27, %v225_v26  ;;  %v224_v33 = vld [vmem:[#allocation2 + $0x60] sm:$0xff]  ;;  %v45_v38 = vld [vmem:[%s946_s0 + $0x38] sm:$0xff] }
  0x1c   :  { %v226_v34 = vld [vmem:[#allocation2 + $0x70] sm:$0xff]  ;;  %v41_v39 = vld [vmem:[%s946_s0 + $0x18] sm:$0xff]  ;;  %v758_v42 = vld [vmem:[%s949_s3] ss:$0 sm:$0xff] }
  0x1d   :  { %74 = vperm.xlu1 %584, %v43_v5   ;;  %54 = vperm.xlu0 %583, %v39_v6   ;;  %v107_v35 = vld [vmem:[%s947_s1 + $0x30] sm:$0xff]  ;;  %v567_v37 = vpack.c.bf16 %v226_v34, %v224_v33  ;;  %v108_v40 = vld [vmem:[%s947_s1 + $0x38] sm:$0xff]  ;;  %v763_v43 = vld [vmem:[%s948_s2] ss:$0 sm:$0xff] }
  0x1e   :  { %560 = vmatpush1.bf16.msra.mxu0 %v559_v22  ;;  %574 = vmatpush1.bf16.msra.mxu1 %v559_v22  ;;  %v103_v36 = vld [vmem:[%s947_s1 + $0x10] sm:$0xff]  ;;  %v104_v41 = vld [vmem:[%s947_s1 + $0x18] sm:$0xff] }
  0x1f   :  { %562 = vmatprep.subr.bf16.mxu0 %v561_v23  ;;  %571 = vmatprep.subr.bf16.mxu1 %v561_v23 }
  0x21   :  { %137 = vperm.xlu1 %584, %v106_v20   ;;  %117 = vperm.xlu0 %583, %v102_v21  }
  0x22   :  { %564 = vmatpush1.bf16.msra.mxu0 %v563_v31  ;;  %575 = vmatpush1.bf16.msra.mxu1 %v563_v31 }
  0x23   :  { %566 = vmatprep.subr.bf16.mxu0 %v565_v32  ;;  %572 = vmatprep.subr.bf16.mxu1 %v565_v32 }
  0x25   :  { %79 = vperm.xlu1 %584, %v44_v29   ;;  %59 = vperm.xlu0 %583, %v40_v30  }
  0x26   :  { %568 = vmatpush1.bf16.msra.mxu0 %v567_v37  ;;  %576 = vmatpush1.bf16.msra.mxu1 %v567_v37 }
  0x29   :  { %142 = vperm.xlu1 %584, %v107_v35   ;;  %122 = vperm.xlu0 %583, %v103_v36  }
  0x2d   :  { %84 = vperm.xlu1 %584, %v45_v38   ;;  %64 = vperm.xlu0 %583, %v41_v39  }
  0x31   :  { %147 = vperm.xlu1 %584, %v108_v40   ;;  %127 = vperm.xlu0 %583, %v104_v41  }
  0x94   :  { %v113_v44 = vpop.permute.xlu1 %112  ;;  %v50_v45 = vpop.permute.xlu0 %49 }
  0x95   :  { %v156_v46 = vsub.f32 %v113_v44, %v758_v42  ;;  %v93_v47 = vsub.f32 %v50_v45, %v763_v43  ;;  %v366_v45 = vld [vmem:[%s950_s4] sm:$0xff] }
  0x97   :  { %v172_v48 = vmul.f32 %v156_v46, %v156_v46  ;;  %v164_v49 = vmul.f32 %v93_v47, %v93_v47  ;;  %v374_v46 = vld [vmem:[%s950_s4 + $0x8] sm:$0xff] }
  0x98   :  { %v133_v50 = vpop.permute.xlu1 %132  ;;  %v70_v51 = vpop.permute.xlu0 %69 }
  0x99   :  { %v180_v52 = vadd.f32 %v172_v48, %v164_v49  ;;  %v160_v53 = vsub.f32 %v133_v50, %v758_v42  ;;  %v97_v54 = vsub.f32 %v70_v51, %v763_v43 }
  0x9b   :  { %vm188_vm1 = vcmp.lt.f32.partialorder %v180_v52, 1.0  ;;  %v176_v55 = vmul.f32 %v160_v53, %v160_v53  ;;  %v168_v56 = vmul.f32 %v97_v54, %v97_v54  ;;  %v378_v53 = vld [vmem:[%s950_s4 + $0x48] sm:$0xff] }
  0x9c   :  { %v75_v57 = vpop.permute.xlu1 %74  ;;  %v55_v58 = vpop.permute.xlu0 %54  ;;  %v537_v59 = vsel %vm188_vm1, 1.0, %v653_v28 }
  0x9d   :  { %v184_v60 = vadd.f32 %v176_v55, %v168_v56  ;;  %545 = vmatmul.mubr.msk.f32.vlgmr.msra.gmra.mrb[0].mxu0 %vm228_vm0, %v537_v59  ;;  %v98_v61 = vsub.f32 %v75_v57, %v763_v43  ;;  %v94_v62 = vsub.f32 %v55_v58, %v763_v43 }
  0x9e   :  { %323 = vmatprep.mubr.f32.mxu0 %v653_v28 }
  0x9f   :  { %vm192_vm2 = vcmp.lt.f32.partialorder %v184_v60, 1.0  ;;  %v169_v4 = vmul.f32 %v98_v61, %v98_v61  ;;  %v165_v5 = vmul.f32 %v94_v62, %v94_v62 }
  0xa0   :  { %v138_v63 = vpop.permute.xlu1 %137  ;;  %v118_v0 = vpop.permute.xlu0 %117  ;;  %v541_v1 = vsel %vm192_vm2, 1.0, %v653_v28 }
  0xa1   :  { %v161_v2 = vsub.f32 %v138_v63, %v758_v42  ;;  %v157_v3 = vsub.f32 %v118_v0, %v758_v42  ;;  %549 = vmatmul.mubr.msk.f32.vlgmr.msra.gmra.mrb[0].mxu1 %vm228_vm0, %v541_v1 }
  0xa2   :  { %347 = vmatprep.mubr.f32.mxu1 %v653_v28 }
  0xa3   :  { %v177_v6 = vmul.f32 %v161_v2, %v161_v2  ;;  %v173_v7 = vmul.f32 %v157_v3, %v157_v3  ;;  %v367_v3 = vld [vmem:[%s950_s4 + $0x10] sm:$0xff] }
  0xa4   :  { %v80_v8 = vpop.permute.xlu1 %79  ;;  %v60_v9 = vpop.permute.xlu0 %59 }
  0xa5   :  { %v185_v10 = vadd.f32 %v177_v6, %v169_v4  ;;  %v181_v11 = vadd.f32 %v173_v7, %v165_v5  ;;  %v99_v12 = vsub.f32 %v80_v8, %v763_v43  ;;  %v95_v13 = vsub.f32 %v60_v9, %v763_v43  ;;  %v375_v4 = vld [vmem:[%s950_s4 + $0x18] sm:$0xff]  ;;  %v371_v5 = vld [vmem:[%s950_s4 + $0x50] sm:$0xff] }
  0xa6   :  { %v379_v6 = vld [vmem:[%s950_s4 + $0x58] sm:$0xff] }
  0xa7   :  { %vm193_vm3 = vcmp.lt.f32.partialorder %v185_v10, 1.0  ;;  %vm189_vm4 = vcmp.lt.f32.partialorder %v181_v11, 1.0  ;;  %v170_v20 = vmul.f32 %v99_v12, %v99_v12  ;;  %v166_v21 = vmul.f32 %v95_v13, %v95_v13 }
  0xa8   :  { %v143_v14 = vpop.permute.xlu1 %142  ;;  %v123_v15 = vpop.permute.xlu0 %122  ;;  %v538_v16 = vsel %vm189_vm4, 1.0, %v653_v28  ;;  %v542_v17 = vsel %vm193_vm3, 1.0, %v653_v28 }
  0xa9   :  { %v162_v18 = vsub.f32 %v143_v14, %v758_v42  ;;  %v158_v19 = vsub.f32 %v123_v15, %v758_v42  ;;  %546 = vmatmul.mubr.msk.f32.gmra.mrb[2].mxu0 %vm228_vm0, %v538_v16  ;;  %550 = vmatmul.mubr.msk.f32.gmra.mrb[2].mxu1 %vm228_vm0, %v542_v17 }
  0xaa   :  { %329 = vmatprep.mubr.f32.mxu0 %v653_v28  ;;  %353 = vmatprep.mubr.f32.mxu1 %v653_v28 }
  0xab   :  { %v178_v22 = vmul.f32 %v162_v18, %v162_v18  ;;  %v174_v23 = vmul.f32 %v158_v19, %v158_v19 }
  0xac   :  { %v85_v24 = vpop.permute.xlu1 %84  ;;  %v65_v25 = vpop.permute.xlu0 %64 }
  0xad   :  { %v186_v26 = vadd.f32 %v178_v22, %v170_v20  ;;  %v182_v27 = vadd.f32 %v174_v23, %v166_v21  ;;  %v100_v29 = vsub.f32 %v85_v24, %v763_v43  ;;  %v96_v30 = vsub.f32 %v65_v25, %v763_v43 }
  0xaf   :  { %vm194_vm5 = vcmp.lt.f32.partialorder %v186_v26, 1.0  ;;  %vm190_vm6 = vcmp.lt.f32.partialorder %v182_v27, 1.0  ;;  %v171_v37 = vmul.f32 %v100_v29, %v100_v29  ;;  %v167_v38 = vmul.f32 %v96_v30, %v96_v30  ;;  %v368_v26 = vld [vmem:[%s950_s4 + $0x20] sm:$0xff]  ;;  %v376_v27 = vld [vmem:[%s950_s4 + $0x28] sm:$0xff] }
  0xb0   :  { %v148_v31 = vpop.permute.xlu1 %147  ;;  %v128_v32 = vpop.permute.xlu0 %127  ;;  %v539_v33 = vsel %vm190_vm6, 1.0, %v653_v28  ;;  %v543_v34 = vsel %vm194_vm5, 1.0, %v653_v28  ;;  %v372_v29 = vld [vmem:[%s950_s4 + $0x60] sm:$0xff]  ;;  %v380_v30 = vld [vmem:[%s950_s4 + $0x68] sm:$0xff] }
  0xb1   :  { %v163_v35 = vsub.f32 %v148_v31, %v758_v42  ;;  %v159_v36 = vsub.f32 %v128_v32, %v758_v42  ;;  %547 = vmatmul.mubr.msk.f32.gmra.mrb[4].mxu0 %vm228_vm0, %v539_v33  ;;  %551 = vmatmul.mubr.msk.f32.gmra.mrb[4].mxu1 %vm228_vm0, %v543_v34 }
  0xb2   :  { %335 = vmatprep.mubr.f32.mxu0 %v653_v28  ;;  %359 = vmatprep.mubr.f32.mxu1 %v653_v28 }
  0xb3   :  { %v179_v39 = vmul.f32 %v163_v35, %v163_v35  ;;  %v175_v40 = vmul.f32 %v159_v36, %v159_v36 }
  0xb5   :  { %v187_v41 = vadd.f32 %v179_v39, %v171_v37  ;;  %v183_v43 = vadd.f32 %v175_v40, %v167_v38 }
  0xb7   :  { %vm195_vm7 = vcmp.lt.f32.partialorder %v187_v41, 1.0  ;;  %vm191_vm8 = vcmp.lt.f32.partialorder %v183_v43, 1.0 }
  0xb8   :  { %v540_v44 = vsel %vm191_vm8, 1.0, %v653_v28  ;;  %v544_v42 = vsel %vm195_vm7, 1.0, %v653_v28  ;;  %v370_v28 = vld [vmem:[%s950_s4 + $0x40] sm:$0xff] }
  0xb9   :  { %548 = vmatmul.mubr.msk.f32.gmra.mrb[6].mxu0 %vm228_vm0, %v540_v44  ;;  %552 = vmatmul.mubr.msk.f32.gmra.mrb[6].mxu1 %vm228_vm0, %v544_v42 }
 0x170   :  { %v319_v47 = vpop.f32.mrb[0].mxu0 }
 0x171   :  { %v382_v48 = vmul.f32 %v366_v45, %v319_v47  ;;  %v414_v49 = vmul.f32 %v374_v46, %v319_v47  ;;  %v321_v50 = vpop.f32.mrb[1].mxu0 }
 0x172   :  { %v390_v51 = vmul.f32 %v374_v46, %v321_v50  ;;  %v406_v52 = vmul.f32 %v366_v45, %v321_v50 }
 0x174   :  { %v815_v54 = vadd.f32 %v390_v51, %v382_v48  ;;  %v817_v55 = vsub.f32 %v406_v52, %v414_v49  ;;  %v343_v56 = vpop.f32.mrb[0].mxu1 }
 0x175   :  { %v386_v57 = vmul.f32 %v370_v28, %v343_v56  ;;  %v418_v58 = vmul.f32 %v378_v53, %v343_v56  ;;  %v345_v59 = vpop.f32.mrb[1].mxu1  ;;  %v373_v56 = vld [vmem:[%s950_s4 + $0x70] sm:$0xff] }
 0x176   :  { %v394_v60 = vmul.f32 %v378_v53, %v345_v59  ;;  %v410_v61 = vmul.f32 %v370_v28, %v345_v59  ;;  %v430_v62 = vmul.f32 %v815_v54, %v815_v54  ;;  %v438_v63 = vmul.f32 %v817_v55, %v817_v55  ;;  %v369_v28 = vld [vmem:[%s950_s4 + $0x30] sm:$0xff]  ;;  %v377_v53 = vld [vmem:[%s950_s4 + $0x38] sm:$0xff] }
 0x178   :  { %v823_v0 = vadd.f32 %v394_v60, %v386_v57  ;;  %v825_v1 = vsub.f32 %v410_v61, %v418_v58  ;;  %v446_v2 = vadd.f32 %v438_v63, %v430_v62  ;;  %v381_v57 = vld [vmem:[%s950_s4 + $0x78] sm:$0xff]  ;;  %s654_s4 = smov [#allocation5]  }
 0x179   :  { %s523_s24 = sshll.u32 %s654_s4, 4  ;;  %s524_s24 = int_to_ptr.vmem [resolvable:$true] %s523_s24 }
 0x17a   :  { %454 = vadd.xlane.f32.xlu0 %v446_v2  ;;  %v434_v7 = vmul.f32 %v823_v0, %v823_v0  ;;  %v442_v8 = vmul.f32 %v825_v1, %v825_v1  ;;  %s623_s25 = scalar_lea.vmem %s524_s24, 2048  ;;  %p628_p9 = scmp.lt.s32.totalorder %s524_s24, %s524_s24 }
 0x17b   :  { %p624_p8 = scmp.ne.s32.totalorder %s524_s24, %s623_s25  ;;  %p629_p10 = scmp.lt.s32.totalorder %s623_s25, %s623_s25 }
 0x17c   :  { %v325_v9 = vpop.f32.mrb[2].mxu0  ;;  %v349_v10 = vpop.f32.mrb[2].mxu1  ;;  %v450_v11 = vadd.f32 %v442_v8, %v434_v7 }
 0x17d   :  { %v383_v12 = vmul.f32 %v367_v3, %v325_v9  ;;  %v415_v13 = vmul.f32 %v375_v4, %v325_v9  ;;  %v387_v14 = vmul.f32 %v371_v5, %v349_v10  ;;  %v419_v15 = vmul.f32 %v379_v6, %v349_v10  ;;  %v327_v16 = vpop.f32.mrb[3].mxu0  ;;  %v351_v17 = vpop.f32.mrb[3].mxu1  ;;  %p630_p11 = por %p629_p10, %p628_p9 }
 0x17e   :  { %v391_v18 = vmul.f32 %v375_v4, %v327_v16  ;;  %v407_v19 = vmul.f32 %v367_v3, %v327_v16  ;;  %v395_v20 = vmul.f32 %v379_v6, %v351_v17  ;;  %v411_v21 = vmul.f32 %v371_v5, %v351_v17  ;;  %462 = vadd.xlane.f32.xlu1 %v450_v11 }
 0x17f   :  { %p631_p12 = pnand %p630_p11, %p624_p8 }
 0x180   :  { %v843_v22 = vadd.f32 %v391_v18, %v383_v12  ;;  %v845_v23 = vsub.f32 %v407_v19, %v415_v13  ;;  %v847_v24 = vadd.f32 %v395_v20, %v387_v14  ;;  %v849_v25 = vsub.f32 %v411_v21, %v419_v15 }
 0x182   :  { %v435_v31 = vmul.f32 %v847_v24, %v847_v24  ;;  %v443_v32 = vmul.f32 %v849_v25, %v849_v25  ;;  %v431_v33 = vmul.f32 %v843_v22, %v843_v22  ;;  %v439_v34 = vmul.f32 %v845_v23, %v845_v23 }
 0x184   :  { %v331_v35 = vpop.f32.mrb[4].mxu0  ;;  %v355_v36 = vpop.f32.mrb[4].mxu1  ;;  %v451_v37 = vadd.f32 %v443_v32, %v435_v31  ;;  %v447_v38 = vadd.f32 %v439_v34, %v431_v33 }
 0x185   :  { %v384_v39 = vmul.f32 %v368_v26, %v331_v35  ;;  %v416_v40 = vmul.f32 %v376_v27, %v331_v35  ;;  %v388_v41 = vmul.f32 %v372_v29, %v355_v36  ;;  %v420_v43 = vmul.f32 %v380_v30, %v355_v36  ;;  %v333_v44 = vpop.f32.mrb[5].mxu0  ;;  %v357_v42 = vpop.f32.mrb[5].mxu1 }
 0x186   :  { %v392_v45 = vmul.f32 %v376_v27, %v333_v44  ;;  %v408_v46 = vmul.f32 %v368_v26, %v333_v44  ;;  %v396_v47 = vmul.f32 %v380_v30, %v357_v42  ;;  %v412_v48 = vmul.f32 %v372_v29, %v357_v42  ;;  %464 = vadd.xlane.f32.xlu0 %v451_v37 }
 0x187   :  { %456 = vadd.xlane.f32.xlu1 %v447_v38 }
 0x188   :  { %v871_v49 = vadd.f32 %v392_v45, %v384_v39  ;;  %v873_v50 = vsub.f32 %v408_v46, %v416_v40  ;;  %v875_v51 = vadd.f32 %v396_v47, %v388_v41  ;;  %v877_v52 = vsub.f32 %v412_v48, %v420_v43 }
 0x18a   :  { %v436_v58 = vmul.f32 %v875_v51, %v875_v51  ;;  %v444_v59 = vmul.f32 %v877_v52, %v877_v52  ;;  %v432_v60 = vmul.f32 %v871_v49, %v871_v49  ;;  %v440_v61 = vmul.f32 %v873_v50, %v873_v50 }
 0x18c   :  { %v337_v62 = vpop.f32.mrb[6].mxu0  ;;  %v361_v63 = vpop.f32.mrb[6].mxu1  ;;  %v452_v2 = vadd.f32 %v444_v59, %v436_v58  ;;  %v448_v3 = vadd.f32 %v440_v61, %v432_v60 }
 0x18d   :  { %v339_v4 = vpop.f32.mrb[7].mxu0  ;;  %v385_v5 = vmul.f32 %v369_v28, %v337_v62  ;;  %v417_v6 = vmul.f32 %v377_v53, %v337_v62  ;;  %v363_v7 = vpop.f32.mrb[7].mxu1  ;;  %v389_v8 = vmul.f32 %v373_v56, %v361_v63  ;;  %v421_v9 = vmul.f32 %v381_v57, %v361_v63 }
 0x18e   :  { %v393_v10 = vmul.f32 %v377_v53, %v339_v4  ;;  %v409_v11 = vmul.f32 %v369_v28, %v339_v4  ;;  %v397_v12 = vmul.f32 %v381_v57, %v363_v7  ;;  %v413_v13 = vmul.f32 %v373_v56, %v363_v7  ;;  %466 = vadd.xlane.f32.xlu1 %v452_v2 }
 0x18f   :  { %458 = vadd.xlane.f32.xlu0 %v448_v3 }
 0x190   :  { %v899_v14 = vadd.f32 %v393_v10, %v385_v5  ;;  %v901_v15 = vsub.f32 %v409_v11, %v417_v6  ;;  %v903_v16 = vadd.f32 %v397_v12, %v389_v8  ;;  %v905_v17 = vsub.f32 %v413_v13, %v421_v9 }
 0x192   :  { %v433_v18 = vmul.f32 %v899_v14, %v899_v14  ;;  %v441_v19 = vmul.f32 %v901_v15, %v901_v15  ;;  %v437_v21 = vmul.f32 %v903_v16, %v903_v16  ;;  %v445_v26 = vmul.f32 %v905_v17, %v905_v17 }
 0x194   :  { %v449_v20 = vadd.f32 %v441_v19, %v433_v18  ;;  %v453_v27 = vadd.f32 %v445_v26, %v437_v21 }
 0x196   :  { %460 = vadd.xlane.f32.xlu0 %v449_v20 }
 0x19a   :  { %468 = vadd.xlane.f32.xlu0 %v453_v27 }
 0x207   :  { %v455_v29 = vpop.xlane.xlu0 %454 }
 0x208   :  { %585 = vrsqrt.f32 %v455_v29 }
 0x20b   :  { %v463_v30 = vpop.xlane.xlu1 %462 }
 0x20c   :  { %587 = vrsqrt.f32 %v463_v30 }
 0x212   :  { %v586_v31 = vpop.eup %585 }
 0x213   :  { %v478_v32 = vmul.f32 11.313708, %v586_v31  ;;  %v465_v33 = vpop.xlane.xlu0 %464 }
 0x214   :  { %v457_v34 = vpop.xlane.xlu1 %456  ;;  %589 = vrsqrt.f32 %v465_v33 }
 0x215   :  { %v486_v35 = vmul.f32 %v478_v32, %v815_v54  ;;  %v502_v36 = vmul.f32 %v478_v32, %v817_v55  ;;  %591 = vrsqrt.f32 %v457_v34 }
 0x216   :  { %v588_v37 = vpop.eup %587 }
 0x217   :  { %494 = vst [vmem:[#allocation5] sm:$0xff] %v486_v35  ;;  %510 = vst [vmem:[#allocation5 + $0x8] sm:$0xff] %v502_v36  ;;  %v482_v38 = vmul.f32 11.313708, %v588_v37 }
 0x219   :  { %v490_v39 = vmul.f32 %v482_v38, %v823_v0  ;;  %v506_v40 = vmul.f32 %v482_v38, %v825_v1 }
 0x21b   :  { %498 = vst [vmem:[#allocation5 + $0x40] sm:$0xff] %v490_v39  ;;  %514 = vst [vmem:[#allocation5 + $0x48] sm:$0xff] %v506_v40  ;;  %v467_v41 = vpop.xlane.xlu1 %466 }
 0x21c   :  { %593 = vrsqrt.f32 %v467_v41  ;;  %v459_v43 = vpop.xlane.xlu0 %458 }
 0x21d   :  { %595 = vrsqrt.f32 %v459_v43 }
 0x21e   :  { %v590_v44 = vpop.eup %589 }
 0x21f   :  { %v592_v42 = vpop.eup %591  ;;  %v483_v54 = vmul.f32 11.313708, %v590_v44 }
 0x220   :  { %v479_v45 = vmul.f32 11.313708, %v592_v42 }
 0x221   :  { %v491_v55 = vmul.f32 %v483_v54, %v847_v24  ;;  %v507_v46 = vmul.f32 %v483_v54, %v849_v25 }
 0x222   :  { %v487_v47 = vmul.f32 %v479_v45, %v843_v22  ;;  %v503_v0 = vmul.f32 %v479_v45, %v845_v23 }
 0x223   :  { %499 = vst [vmem:[#allocation5 + $0x50] sm:$0xff] %v491_v55  ;;  %515 = vst [vmem:[#allocation5 + $0x58] sm:$0xff] %v507_v46  ;;  %v461_v1 = vpop.xlane.xlu0 %460 }
 0x224   :  { %495 = vst [vmem:[#allocation5 + $0x10] sm:$0xff] %v487_v47  ;;  %511 = vst [vmem:[#allocation5 + $0x18] sm:$0xff] %v503_v0  ;;  %597 = vrsqrt.f32 %v461_v1 }
 0x226   :  { %v594_v48 = vpop.eup %593 }
 0x227   :  { %v596_v28 = vpop.eup %595  ;;  %v484_v53 = vmul.f32 11.313708, %v594_v48  ;;  %v469_v56 = vpop.xlane.xlu0 %468 }
 0x228   :  { %v480_v57 = vmul.f32 11.313708, %v596_v28  ;;  %599 = vrsqrt.f32 %v469_v56 }
 0x229   :  { %v492_v24 = vmul.f32 %v484_v53, %v875_v51  ;;  %v508_v25 = vmul.f32 %v484_v53, %v877_v52 }
 0x22a   :  { %v488_v22 = vmul.f32 %v480_v57, %v871_v49  ;;  %v504_v23 = vmul.f32 %v480_v57, %v873_v50 }
 0x22b   :  { %500 = vst [vmem:[#allocation5 + $0x60] sm:$0xff] %v492_v24  ;;  %516 = vst [vmem:[#allocation5 + $0x68] sm:$0xff] %v508_v25 }
 0x22c   :  { %496 = vst [vmem:[#allocation5 + $0x20] sm:$0xff] %v488_v22  ;;  %512 = vst [vmem:[#allocation5 + $0x28] sm:$0xff] %v504_v23 }
 0x22e   :  { %v598_v58 = vpop.eup %597 }
 0x22f   :  { %v481_v59 = vmul.f32 11.313708, %v598_v58 }
 0x231   :  { %v489_v60 = vmul.f32 %v481_v59, %v899_v14  ;;  %v505_v61 = vmul.f32 %v481_v59, %v901_v15 }
 0x232   :  { %v600_v62 = vpop.eup %599 }
 0x233   :  { %497 = vst [vmem:[#allocation5 + $0x30] sm:$0xff] %v489_v60  ;;  %513 = vst [vmem:[#allocation5 + $0x38] sm:$0xff] %v505_v61  ;;  %v485_v51 = vmul.f32 11.313708, %v600_v62 }
 0x235   :  { %v493_v49 = vmul.f32 %v485_v51, %v903_v16  ;;  %v509_v50 = vmul.f32 %v485_v51, %v905_v17 }
 0x237   :  { %501 = vst [vmem:[#allocation5 + $0x70] sm:$0xff] %v493_v49  ;;  %517 = vst [vmem:[#allocation5 + $0x78] sm:$0xff] %v509_v50 }
 0x238   :  { %634 = shalt.err (!%p631_p12)
}
 0x239   :  { %s635_s28 = scalar_lea.hbm %s952_s6, 2048 }
 0x23a   :  { %p636_p13 = scmp.ne.s32.totalorder %s952_s6, %s635_s28  ;;  %p639_p0 = scmp.lt.u32.totalorder %s635_s28, %s952_s6 }
 0x23c   :  { %p641_p1 = pnand %p639_p0, %p636_p13 }
 0x23e   :  { %644 = shalt.err (!%p641_p1)
}
 0x23f   :  { %529 = dma.vmem_to_hbm [thread:$0]  %s524_s24, 2048, %s952_s6, [#allocation4], %s650_s7, %s650_s7, %s651_s8  }
 0x240   :  { %647 = dma.done.wait [#allocation4], 2048  }
 0x241   :  { %648 = vsyncadd [#allocation4], 4294965248 }
 0x242   :  { %533 = vsyncpa [#allocation3], 1 }
 0x243   :  { %534 = vsyncpa [#allocation4], 1 }

</bundles_post_ra>
